<compile_context>
chip_gen: v5e
topology: v5e:2x2
jax: 0.10.0
libtpu: 0.0.40
codegen_flags: <defaults>
</compile_context>

<pallas_src>
import jax
import jax.numpy as jnp
from jax.experimental import pallas as pl
from jax.experimental.pallas import tpu as pltpu


def iris_mlp_kernel(xt_ref, w1_ref, b1_ref, w2_ref, b2_ref, ot_ref):
    # xt: (in, B_blk)  w1: (H, in)  b1: (H, 1)  w2: (out, H)  b2: (out, 1)
    # fc1 on the MXU: H^T = W1 @ X^T, f32 accumulation.
    ht = jnp.dot(w1_ref[...], xt_ref[...],
                 preferred_element_type=jnp.float32) + b1_ref[...]
    # ReLU on the VPU (only elementwise pass besides the bias adds / cast).
    ht = jnp.maximum(ht, 0.0)
    # fc2 on the MXU: O^T = W2 @ H^T, f32 accumulation.
    ot = jnp.dot(w2_ref[...], ht,
                 preferred_element_type=jnp.float32) + b2_ref[...]
    ot_ref[...] = ot.astype(ot_ref.dtype)


def prepare_params(w1, b1, w2, b2):
    """One-time transform from PyTorch Linear layout to kernel layout.

    Weights stay in PyTorch orientation (w1: (H, in), w2: (out, H)) because the
    kernel computes in the transposed (batch-on-lanes) layout; biases become
    column vectors for broadcasting against (H, B) / (out, B).
    Do this at init, not per forward.
    """
    return w1, b1.reshape(-1, 1), w2, b2.reshape(-1, 1)


def iris_classifier_forward(x, w1, b1c, w2, b2c, *, batch_block=4096):
    """x: (B, input_size) f32; params already in kernel layout (prepare_params).

    Returns (B, output_size) f32, matching IrisClassifier.forward.
    """
    batch, in_size = x.shape
    hidden = w1.shape[0]
    out_size = w2.shape[0]

    # Layout plumbing only: put batch on the lane (last) axis.
    xt = x.T                                   # (in, B)

    flops = 2 * batch * (in_size * hidden + hidden * out_size)
    bytes_accessed = 4 * (x.size + w1.size + b1c.size + w2.size + b2c.size
                          + batch * out_size)
    cost = pl.CostEstimate(flops=flops, transcendentals=0,
                           bytes_accessed=bytes_accessed)

    if batch <= batch_block:
        # Iris-scale batch: single grid-less invocation — wall time here is
        # dominated by call overhead, so the only win is fewer invocations
        # (batch calls together at the caller if this runs in a loop).
        vmem = pl.BlockSpec(memory_space=pltpu.MemorySpace.VMEM)
        out_t = pl.pallas_call(
            iris_mlp_kernel,
            out_shape=jax.ShapeDtypeStruct((out_size, batch), jnp.float32),
            in_specs=[vmem, vmem, vmem, vmem, vmem],
            out_specs=vmem,
            cost_estimate=cost,
        )(xt, w1, b1c, w2, b2c)
        return out_t.T

    # Large batch: tile the lane (batch) axis.  Weights/biases stay VMEM
    # resident (index_map always block (0, 0)); batch axis "parallel" so the
    # two TensorCores on v7x each take a share of the tiles.
    num_blocks = pl.cdiv(batch, batch_block)
    padded = num_blocks * batch_block
    if padded != batch:                        # ragged tail: pad lanes, slice after
        xt = jnp.pad(xt, ((0, 0), (0, padded - batch)))

    out_t = pl.pallas_call(
        iris_mlp_kernel,
        out_shape=jax.ShapeDtypeStruct((out_size, padded), jnp.float32),
        grid_spec=pltpu.PrefetchScalarGridSpec(
            num_scalar_prefetch=0,
            grid=(num_blocks,),
            in_specs=[
                pl.BlockSpec((in_size, batch_block), lambda i: (0, i)),
                pl.BlockSpec((hidden, in_size), lambda i: (0, 0)),
                pl.BlockSpec((hidden, 1), lambda i: (0, 0)),
                pl.BlockSpec((out_size, hidden), lambda i: (0, 0)),
                pl.BlockSpec((out_size, 1), lambda i: (0, 0)),
            ],
            out_specs=pl.BlockSpec((out_size, batch_block), lambda i: (0, i)),
        ),
        compiler_params=pltpu.CompilerParams(
            dimension_semantics=("parallel",)),
        cost_estimate=cost,
    )(xt, w1, b1c, w2, b2c)
    return out_t[:, :batch].T


def init_params(key, input_size, hidden_size, output_size):
    """Deterministic init mimicking nn.Linear's U(-1/sqrt(fan_in), 1/sqrt(fan_in))."""
    k1, k2, k3, k4 = jax.random.split(key, 4)
    bound1 = 1.0 / jnp.sqrt(jnp.float32(input_size))
    bound2 = 1.0 / jnp.sqrt(jnp.float32(hidden_size))
    w1 = jax.random.uniform(k1, (hidden_size, input_size), jnp.float32, -bound1, bound1)
    b1 = jax.random.uniform(k2, (hidden_size,), jnp.float32, -bound1, bound1)
    w2 = jax.random.uniform(k3, (output_size, hidden_size), jnp.float32, -bound2, bound2)
    b2 = jax.random.uniform(k4, (output_size,), jnp.float32, -bound2, bound2)
    return w1, b1, w2, b2


if __name__ == "__main__":
    # Iris-style sizes: 4 features, 32 hidden, 3 classes.
    input_size, hidden_size, output_size = 4, 32, 3

    key = jax.random.PRNGKey(0)
    kx, kp = jax.random.split(key)
    w1, b1, w2, b2 = init_params(kp, input_size, hidden_size, output_size)

    # One-time (init-side) layout prep — removed from the per-forward hot path.
    w1k, b1c, w2k, b2c = prepare_params(w1, b1, w2, b2)

    def ref_forward(xs):
        return jnp.maximum(xs @ w1.T + b1, 0.0) @ w2.T + b2

    # Path 1: small batch (grid-less single invocation).
    x_small = jax.random.normal(kx, (8, input_size), jnp.float32)
    out_small = jax.block_until_ready(
        iris_classifier_forward(x_small, w1k, b1c, w2k, b2c))
    assert out_small.shape == (8, output_size)
    assert jnp.allclose(out_small, ref_forward(x_small), atol=1e-5, rtol=1e-5)

    # Path 2: batch-tiled grid path, lane-dense tiles (2 tiles of 128).
    x_big = jax.random.normal(kx, (256, input_size), jnp.float32)
    out_big = jax.block_until_ready(
        iris_classifier_forward(x_big, w1k, b1c, w2k, b2c, batch_block=128))
    assert out_big.shape == (256, output_size)
    assert jnp.allclose(out_big, ref_forward(x_big), atol=1e-5, rtol=1e-5)

    # Path 3: ragged batch on the grid path (padded to a tile multiple, sliced).
    x_rag = jax.random.normal(kx, (200, input_size), jnp.float32)
    out_rag = jax.block_until_ready(
        iris_classifier_forward(x_rag, w1k, b1c, w2k, b2c, batch_block=128))
    assert out_rag.shape == (200, output_size)
    assert jnp.allclose(out_rag, ref_forward(x_rag), atol=1e-5, rtol=1e-5)

    print("KERNEL_OK")
</pallas_src>

<mosaic_0001>
module attributes {stable_mosaic.version = 11 : i64} {
  func.func @iris_mlp_kernel(%arg0: memref<4x8xf32, #tpu.memory_space<vmem>>, %arg1: memref<32x4xf32, #tpu.memory_space<vmem>>, %arg2: memref<32x1xf32, #tpu.memory_space<vmem>>, %arg3: memref<3x32xf32, #tpu.memory_space<vmem>>, %arg4: memref<3x1xf32, #tpu.memory_space<vmem>>, %arg5: memref<3x8xf32, #tpu.memory_space<vmem>>) attributes {dimension_semantics = [], scalar_prefetch = 0 : i64, scratch_operands = 0 : i64, tpu.core_type = #tpu.core_type<tc>} {
    %c0 = arith.constant 0 : index
    %c0_0 = arith.constant 0 : index
    %0 = vector.load %arg1[%c0, %c0_0] : memref<32x4xf32, #tpu.memory_space<vmem>>, vector<32x4xf32>
    %c0_1 = arith.constant 0 : index
    %c0_2 = arith.constant 0 : index
    %1 = vector.load %arg0[%c0_1, %c0_2] : memref<4x8xf32, #tpu.memory_space<vmem>>, vector<4x8xf32>
    %cst = arith.constant dense<0.000000e+00> : vector<32x8xf32>
    %2 = tpu.matmul %0, %1, %cst {dimension_numbers = #tpu.dot_dimension_numbers<[1], [0], [0], [1], [0, 0, 1, 1], [], []>} : vector<32x4xf32>, vector<4x8xf32>, vector<32x8xf32> -> vector<32x8xf32>
    %c0_3 = arith.constant 0 : index
    %c0_4 = arith.constant 0 : index
    %3 = vector.load %arg2[%c0_3, %c0_4] : memref<32x1xf32, #tpu.memory_space<vmem>>, vector<32x1xf32>
    %4 = vector.broadcast %3 : vector<32x1xf32> to vector<32x8xf32>
    %5 = arith.addf %2, %4 : vector<32x8xf32>
    %cst_5 = arith.constant 0.000000e+00 : f32
    %6 = vector.broadcast %cst_5 : f32 to vector<32x8xf32>
    %7 = arith.maximumf %5, %6 : vector<32x8xf32>
    %c0_6 = arith.constant 0 : index
    %c0_7 = arith.constant 0 : index
    %8 = vector.load %arg3[%c0_6, %c0_7] : memref<3x32xf32, #tpu.memory_space<vmem>>, vector<3x32xf32>
    %cst_8 = arith.constant dense<0.000000e+00> : vector<3x8xf32>
    %9 = tpu.matmul %8, %7, %cst_8 {dimension_numbers = #tpu.dot_dimension_numbers<[1], [0], [0], [1], [0, 0, 1, 1], [], []>} : vector<3x32xf32>, vector<32x8xf32>, vector<3x8xf32> -> vector<3x8xf32>
    %c0_9 = arith.constant 0 : index
    %c0_10 = arith.constant 0 : index
    %10 = vector.load %arg4[%c0_9, %c0_10] : memref<3x1xf32, #tpu.memory_space<vmem>>, vector<3x1xf32>
    %11 = vector.broadcast %10 : vector<3x1xf32> to vector<3x8xf32>
    %12 = arith.addf %9, %11 : vector<3x8xf32>
    %c0_11 = arith.constant 0 : index
    %c0_12 = arith.constant 0 : index
    %13 = vector.load %arg5[%c0_11, %c0_12] : memref<3x8xf32, #tpu.memory_space<vmem>>, vector<3x8xf32>
    tpu.vector_store %arg5[%c0_11, %c0_12], %12 {strides = array<i32>} : memref<3x8xf32, #tpu.memory_space<vmem>>, vector<3x8xf32>,
    return
  }
}

</mosaic_0001>

<bundles_post_ra>
// kernel: tpu_custom_call.1
= control target key start
LH: loop header
LB: loop body
LE: loop exit
PB: predicated region body
PF: predicated region fallthrough
CT: control target
= control target key end

     0   :  { %vm63_vm0 = vcmask 1043456   ;;  %vm50_vm1 = vcmask 31744   ;;  %v188_v5 = vmov 0   ;;  %s260_s0 = inlined_call_operand.vmem [shape: f32[4,8], index: 0, kind: input, shape index: {}]   ;;  %s261_s1 = inlined_call_operand.vmem [shape: f32[32,4], index: 1, kind: input, shape index: {}]   ;;  %s262_s2 = inlined_call_operand.vmem [shape: f32[32,1], index: 2, kind: input, shape index: {}]   ;;  %s263_s3 = inlined_call_operand.vmem [shape: f32[3,32], index: 3, kind: input, shape index: {}]   ;;  %s264_s4 = inlined_call_operand.vmem [shape: f32[3,1], index: 4, kind: input, shape index: {}]   ;;  %s265_s5 = inlined_call_operand.hbm [shape: f32[3,8], index: 5, kind: output, shape index: {}]  }
   0x1   :  { %v25_v0 = vld [vmem:[%s260_s0] sm:$0xf]  ;;  %v22_v1 = vld [vmem:[%s261_s1 + $0x8] sm:$0xff]  ;;  %v24_v2 = vld [vmem:[%s261_s1 + $0x18] sm:$0xff]  ;;  %159 = vset.pattern.permute.xlu0 %v188_v5 }
   0x2   :  { %155 = vmatpush.msk.msra.mxu2 %vm63_vm0, %v25_v0  ;;  %156 = vmatpush.msk.msra.mxu3 %vm63_vm0, %v25_v0  ;;  %v29_v3 = vld [vmem:[%s262_s2 + $0x18] sm:$0xff]  ;;  %v21_v4 = vld [vmem:[%s261_s1] sm:$0xff]  ;;  %v27_v6 = vld [vmem:[%s262_s2 + $0x8] sm:$0xff] }
   0x3   :  { %151 = vmatmul.msk.f32.vlgmr.msra.gmra.mxu2 %vm50_vm1, %v22_v1  ;;  %153 = vmatmul.msk.f32.vlgmr.msra.gmra.mxu3 %vm50_vm1, %v24_v2 }
   0x4   :  { %149 = vmatpush.msk.msra.mxu0 %vm63_vm0, %v25_v0 }
   0x5   :  { %10 = vsyncpa [#allocation3], 0  ;;  %47 = vperm.xlu0 %159, %v29_v3   ;;  %150 = vmatmul.msk.f32.vlgmr.msra.gmra.mxu0 %vm50_vm1, %v21_v4  ;;  %v23_v7 = vld [vmem:[%s261_s1 + $0x10] sm:$0xff]  ;;  %v26_v9 = vld [vmem:[%s262_s2] sm:$0xff]  ;;  %vm107_vm2 = vcmask 261120   ;;  %s140_s15 = sshll.u32 %s265_s5, 4  ;;  %s141_s15 = int_to_ptr.hbm [resolvable:$true] %s140_s15 }
   0x6   :  { %160 = vset.pattern.permute.xlu1 %v188_v5  ;;  %161 = vset.pattern.permute.xlu2 %v188_v5  ;;  %v28_v8 = vld [vmem:[%s262_s2 + $0x10] sm:$0xff]  ;;  %v101_v10 = vld [vmem:[%s264_s4] sm:$0x7]  ;;  %s189_s4 = smov [#allocation2]   ;;  %vm131_vm3 = vcmask 59392  }
   0x7   :  { %37 = vperm.xlu1 %160, %v27_v6   ;;  %104 = vperm.xlu2 %161, %v101_v10   ;;  %v100_v27 = vld [vmem:[%s263_s3] sm:$0x7]  ;;  %s138_s12 = sshll.u32 %s189_s4, 4  ;;  %s139_s12 = int_to_ptr.vmem [resolvable:$true] %s138_s12 }
   0xb   :  { %152 = vmatmul.msk.f32.gmra.mxu2 %vm50_vm1, %v23_v7 }
   0xd   :  { %42 = vperm.xlu0 %159, %v28_v8  }
   0xf   :  { %32 = vperm.xlu1 %160, %v26_v9  }
  0x61   :  { %v105_v28 = vpop.permute.xlu2 %104 }
  0x77   :  { %v48_v11 = vpop.permute.xlu0 %47 }
  0x79   :  { %v38_v12 = vpop.permute.xlu1 %37 }
  0x7f   :  { %v43_v17 = vpop.permute.xlu0 %42 }
  0x81   :  { %v33_v18 = vpop.permute.xlu1 %32 }
  0x82   :  { %v84_v19 = vpop.f32.mrf.mxu0 }
  0x83   :  { %v85_v23 = vadd.f32 %v84_v19, %v33_v18 }
  0x85   :  { %v96_v26 = vmax.f32 %v85_v23, 0.0 }
  0x86   :  { %v87_v13 = vpop.f32.mrf.mxu2  ;;  %v93_v14 = vpop.f32.mrf.mxu3 }
  0x87   :  { %v94_v15 = vadd.f32 %v93_v14, %v48_v11  ;;  %v88_v21 = vadd.f32 %v87_v13, %v38_v12 }
  0x89   :  { %v99_v16 = vmax.f32 %v94_v15, 0.0  ;;  %v97_v25 = vmax.f32 %v88_v21, 0.0 }
  0x8b   :  { %123 = vmatpush.msra.mxu1 %v99_v16 }
  0x8e   :  { %v90_v20 = vpop.f32.mrf.mxu2 }
  0x8f   :  { %v91_v22 = vadd.f32 %v90_v20, %v43_v17 }
  0x91   :  { %v98_v24 = vmax.f32 %v91_v22, 0.0 }
  0x93   :  { %124 = vmatpush.msra.mxu1 %v98_v24 }
  0x95   :  { %125 = vmatpush.msra.mxu1 %v97_v25 }
  0x97   :  { %126 = vmatpush.msra.mxu1 %v96_v26 }
  0x98   :  { %154 = vmatmul.msk.f32.vlgmr.msra.gmra.mxu1 %vm107_vm2, %v100_v27 }
 0x115   :  { %v128_v29 = vpop.f32.mrf.mxu1 }
 0x116   :  { %v129_v30 = vadd.f32 %v128_v29, %v105_v28 }
 0x118   :  { %132 = vst.msk [vmem:[#allocation2] sm:$0x7] %vm131_vm3, %v129_v30 }
 0x119   :  { %143 = dma.vmem_to_hbm [thread:$0]  %s139_s12, 64, %s141_s15, [#allocation3]  }
 0x11a   :  { %186 = dma.done.wait [#allocation3], 64  }
 0x11b   :  { %187 = vsyncadd [#allocation3], 4294967232 }
 0x11c   :  { %148 = vsyncpa [#allocation3], 1 }

</bundles_post_ra>
